<compile_context>
chip_gen: v5e
topology: v5e:2x2
jax: 0.10.0
libtpu: 0.0.40
codegen_flags: <defaults>
</compile_context>

<pallas_src>
import functools
import math

import jax
import jax.numpy as jnp
from jax import lax
from jax.experimental import pallas as pl
from jax.experimental.pallas import tpu as pltpu


_MASK_VALUE = -0.7 * float(jnp.finfo(jnp.float32).max)


def _attn_kernel(x_ref, hm_ref, cmask_ref, wqkv_ref, bqkv_ref, wp_ref, bp_ref,
                 o_ref, *, n_head: int, approx_recip: bool):
    """One batch chunk: x block (Bb, T, C) -> out block (Bb, T, C)."""
    Bb, T, C = x_ref.shape
    H = n_head
    cdt = wqkv_ref.dtype             # MXU compute dtype (bf16 or f32)

    # ---- fused QKV projection: one (Bb*T, C) x (C, 3C) MXU pass, f32 accumulate.
    x2d = x_ref[...].reshape(Bb * T, C).astype(cdt)
    qkv = jnp.dot(x2d, wqkv_ref[...], preferred_element_type=jnp.float32)
    qkv = qkv + bqkv_ref[0]                                      # (Bb*T, 3C) f32

    # Split fused QKV BEFORE any head replication (3 full-width lane slices).
    # The 1/sqrt(D) scale is already folded into the Q weight/bias.
    q3 = qkv[:, 0 * C:1 * C].reshape(Bb, T, C)                   # f32
    k3 = qkv[:, 1 * C:2 * C].reshape(Bb, T, C).astype(cdt)       # (Bb, T, C)
    v3 = qkv[:, 2 * C:3 * C].reshape(Bb, T, C).astype(cdt)       # (Bb, T, C)

    # Per-head channel mask (H, 1, C): precomputed constant input, not iota.
    hm = hm_ref[...]                                             # f32 0/1

    # Broadcast + mask ONLY Q; heads become extra rows of one batched matmul.
    # q is exactly zero outside head h's channels, so contracting the full C
    # axis equals the per-head (T, D) x (D, T) product.  K is not replicated.
    qh = (q3[:, None, :, :] * hm[None]).reshape(Bb, H * T, C).astype(cdt)

    # ---- scores: one batched MXU pass (Bb, H*T, C) x (Bb, T, C) -> (Bb, H*T, T).
    s = jnp.einsum('bmc,bsc->bms', qh, k3,
                   preferred_element_type=jnp.float32)           # f32

    # Causal mask: precomputed additive bias (H*T, T) of {0, -BIG}, constant.
    s = s + cmask_ref[...]

    # ---- softmax in f32 (VPU exp/max/sum; reciprocal on the EUP slot).
    s = s - jnp.max(s, axis=-1, keepdims=True)
    p = jnp.exp(s)
    denom = jnp.sum(p, axis=-1, keepdims=True)
    p = p * pl.reciprocal(denom, approx=approx_recip)

    # ---- weighted values.  V is NOT replicated: apply the per-head channel
    # mask to the matmul OUTPUT (identical math, head outputs land in their
    # own disjoint D-channel blocks, zeros elsewhere).
    y_full = jnp.einsum('bms,bsc->bmc', p.astype(cdt), v3,
                        preferred_element_type=jnp.float32)      # (Bb, H*T, C)
    y4 = y_full.reshape(Bb, H, T, C) * hm[None]                  # per-head mask

    # Combine heads: disjoint channel blocks -> unrolled VPU adds over the
    # leading head axis re-pack (T, C) with no lane slicing / concatenate.
    y_comb = y4[:, 0]
    for h in range(1, H):
        y_comb = y_comb + y4[:, h]
    y2d = y_comb.reshape(Bb * T, C)

    # ---- output projection.
    out = jnp.dot(y2d.astype(cdt), wp_ref[...],
                  preferred_element_type=jnp.float32) + bp_ref[0]
    # NOTE: last dim C=32 < 128 -> masked stores; lane-dense only once C%128==0.
    o_ref[...] = out.reshape(Bb, T, C).astype(o_ref.dtype)


def fuse_params(params, n_head, compute_dtype=jnp.bfloat16):
    """One-time weight prep: fuse Q/K/V into (C, 3C), fold the 1/sqrt(D) score
    scale into the Q weight+bias, cast matmul weights to the MXU compute dtype
    (biases stay f32; they are added after f32 accumulation)."""
    C = params["wq"].shape[0]
    scale = 1.0 / math.sqrt(C // n_head)
    wqkv = jnp.concatenate(
        [params["wq"] * scale, params["wk"], params["wv"]], axis=1)   # (C, 3C)
    bqkv = jnp.concatenate(
        [params["bq"] * scale, params["bk"], params["bv"]], axis=1)   # (1, 3C)
    return {
        "wqkv": wqkv.astype(compute_dtype),
        "bqkv": bqkv.astype(jnp.float32),
        "wp": params["wp"].astype(compute_dtype),
        "bp": params["bp"].astype(jnp.float32),
    }


def causal_self_attention(x, fused_params, n_head):
    """x: (B, T, C) float32.  fused_params from fuse_params()."""
    B, T, C = x.shape
    H = n_head
    D = C // H

    wqkv, bqkv = fused_params["wqkv"], fused_params["bqkv"]
    wp, bp = fused_params["wp"], fused_params["bp"]
    cdt = wqkv.dtype
    approx = (cdt == jnp.bfloat16)

    # Cast activations to the MXU compute dtype wrapper-side (halves x DMA in
    # the bf16 path); output stays in x.dtype.
    x_in = x if x.dtype == cdt else x.astype(cdt)

    # One grid step unless each half-batch chunk has enough rows to amortize
    # the ~0.35us/step overhead.  The 2-way split targets v7x's two TCs
    # (dimension_semantics "parallel"); on single-TC v5e/v6e large chunks
    # still benefit from DMA/compute pipelining, tiny ones do not.
    n_steps = 2 if (B % 2 == 0 and (B // 2) * T >= 256) else 1
    Bb = B // n_steps

    # Hoisted constants: per-head channel mask and additive causal bias.
    chan = jnp.arange(C, dtype=jnp.int32)
    head = jnp.arange(H, dtype=jnp.int32)
    hm = ((chan[None, :] // D) == head[:, None]).astype(jnp.float32)
    hm = hm.reshape(H, 1, C)                                        # (H, 1, C)
    tri = jnp.tril(jnp.ones((T, T), dtype=bool))
    cmask = jnp.tile(
        jnp.where(tri, 0.0, _MASK_VALUE).astype(jnp.float32), (H, 1))  # (H*T, T)

    kernel = functools.partial(_attn_kernel, n_head=H, approx_recip=approx)
    x_spec = pl.BlockSpec((Bb, T, C), lambda b: (b, 0, 0))

    return pl.pallas_call(
        kernel,
        out_shape=jax.ShapeDtypeStruct((B, T, C), x.dtype),
        grid_spec=pltpu.PrefetchScalarGridSpec(
            num_scalar_prefetch=0,
            grid=(n_steps,),
            in_specs=[
                x_spec,
                pl.BlockSpec((H, 1, C), lambda b: (0, 0, 0)),     # head mask (const)
                pl.BlockSpec((H * T, T), lambda b: (0, 0)),       # causal bias (const)
                pl.BlockSpec((C, 3 * C), lambda b: (0, 0)),       # fused QKV weight
                pl.BlockSpec((1, 3 * C), lambda b: (0, 0)),       # fused QKV bias
                pl.BlockSpec((C, C), lambda b: (0, 0)),           # output proj weight
                pl.BlockSpec((1, C), lambda b: (0, 0)),           # output proj bias
            ],
            out_specs=pl.BlockSpec((Bb, T, C), lambda b: (b, 0, 0)),
        ),
        compiler_params=pltpu.CompilerParams(
            dimension_semantics=("parallel",)),
    )(x_in, hm, cmask, wqkv, bqkv, wp, bp)


def _reference(x, params, n_head):
    """Pure-JAX reference mirroring the PyTorch forward (eval mode)."""
    B, T, C = x.shape
    D = C // n_head

    def lin(t, w, b):
        return t @ w + b[0]

    q = lin(x, params["wq"], params["bq"]).reshape(B, T, n_head, D).transpose(0, 2, 1, 3)
    k = lin(x, params["wk"], params["bk"]).reshape(B, T, n_head, D).transpose(0, 2, 1, 3)
    v = lin(x, params["wv"], params["bv"]).reshape(B, T, n_head, D).transpose(0, 2, 1, 3)

    att = jnp.einsum("bhtd,bhsd->bhts", q, k) * (1.0 / math.sqrt(D))
    mask = jnp.tril(jnp.ones((T, T), dtype=bool))
    att = jnp.where(mask[None, None], att, -jnp.inf)
    att = jax.nn.softmax(att, axis=-1)
    y = jnp.einsum("bhts,bhsd->bhtd", att, v)
    y = y.transpose(0, 2, 1, 3).reshape(B, T, C)
    return lin(y, params["wp"], params["bp"])


def _init_params(key, n_embd):
    """Deterministic init mimicking nn.Linear's U(-1/sqrt(fan_in), 1/sqrt(fan_in)).
    Weights are stored transposed as (C_in, C_out) so the kernel does x @ W."""
    bound = 1.0 / math.sqrt(n_embd)
    names = ["q", "k", "v", "p"]
    keys = jax.random.split(key, 2 * len(names))
    params = {}
    for i, n in enumerate(names):
        params[f"w{n}"] = jax.random.uniform(
            keys[2 * i], (n_embd, n_embd), jnp.float32, -bound, bound)
        params[f"b{n}"] = jax.random.uniform(
            keys[2 * i + 1], (1, n_embd), jnp.float32, -bound, bound)
    return params


if __name__ == "__main__":
    # Small config: N_EMBD=32, N_HEADS=4, seq length T=8 (<= MAX_LEN+NUM_PROPS).
    B, T, C, H = 2, 8, 32, 4

    key = jax.random.PRNGKey(0)
    kx, kp = jax.random.split(key)
    x = jax.random.normal(kx, (B, T, C), dtype=jnp.float32)
    params = _init_params(kp, C)
    ref = _reference(x, params, H)

    # f32 MXU path: tight numerical check of the kernel math.
    out_f32 = jax.block_until_ready(
        causal_self_attention(x, fuse_params(params, H, jnp.float32), H))
    assert out_f32.shape == (B, T, C)
    assert jnp.allclose(out_f32, ref, atol=1e-3, rtol=1e-3), "f32 mismatch vs reference"

    # bf16 MXU operands / f32 accumulation (the performance configuration).
    out_bf16 = jax.block_until_ready(
        causal_self_attention(x, fuse_params(params, H, jnp.bfloat16), H))
    assert out_bf16.shape == (B, T, C)
    assert jnp.allclose(out_bf16, ref, atol=5e-2, rtol=5e-2), "bf16 mismatch vs reference"

    print("KERNEL_OK")
</pallas_src>

<mosaic_0001>
module attributes {stable_mosaic.version = 11 : i64} {
  func.func @_attn_kernel(%arg0: i32, %arg1: memref<2x8x32xf32, #tpu.memory_space<vmem>>, %arg2: memref<4x1x32xf32, #tpu.memory_space<vmem>>, %arg3: memref<32x8xf32, #tpu.memory_space<vmem>>, %arg4: memref<32x96xf32, #tpu.memory_space<vmem>>, %arg5: memref<1x96xf32, #tpu.memory_space<vmem>>, %arg6: memref<32x32xf32, #tpu.memory_space<vmem>>, %arg7: memref<1x32xf32, #tpu.memory_space<vmem>>, %arg8: memref<2x8x32xf32, #tpu.memory_space<vmem>>) attributes {dimension_semantics = [#tpu.dimension_semantics<parallel>], iteration_bounds = array<i64: 1>, scalar_prefetch = 0 : i64, scratch_operands = 0 : i64, tpu.core_type = #tpu.core_type<tc>, window_params = [{transform_indices = @transform_0, window_bounds = array<i64: 2, 8, 32>}, {pipeline_mode = #tpu.pipeline_mode<synchronous>, transform_indices = @transform_1, window_bounds = array<i64: 4, 1, 32>}, {pipeline_mode = #tpu.pipeline_mode<synchronous>, transform_indices = @transform_2, window_bounds = array<i64: 32, 8>}, {pipeline_mode = #tpu.pipeline_mode<synchronous>, transform_indices = @transform_3, window_bounds = array<i64: 32, 96>}, {pipeline_mode = #tpu.pipeline_mode<synchronous>, transform_indices = @transform_4, window_bounds = array<i64: 1, 96>}, {pipeline_mode = #tpu.pipeline_mode<synchronous>, transform_indices = @transform_5, window_bounds = array<i64: 32, 32>}, {pipeline_mode = #tpu.pipeline_mode<synchronous>, transform_indices = @transform_6, window_bounds = array<i64: 1, 32>}, {transform_indices = @transform_7, window_bounds = array<i64: 2, 8, 32>}]} {
    %c0 = arith.constant 0 : index
    %c0_0 = arith.constant 0 : index
    %c0_1 = arith.constant 0 : index
    %0 = vector.load %arg1[%c0, %c0_0, %c0_1] : memref<2x8x32xf32, #tpu.memory_space<vmem>>, vector<2x8x32xf32>
    %1 = vector.shape_cast %0 : vector<2x8x32xf32> to vector<16x32xf32>
    %c0_2 = arith.constant 0 : index
    %c0_3 = arith.constant 0 : index
    %2 = vector.load %arg4[%c0_2, %c0_3] : memref<32x96xf32, #tpu.memory_space<vmem>>, vector<32x96xf32>
    %cst = arith.constant dense<0.000000e+00> : vector<16x96xf32>
    %3 = tpu.matmul %1, %2, %cst {dimension_numbers = #tpu.dot_dimension_numbers<[1], [0], [0], [1], [0, 0, 1, 1], [], []>} : vector<16x32xf32>, vector<32x96xf32>, vector<16x96xf32> -> vector<16x96xf32>
    %c0_4 = arith.constant 0 : index
    %c0_5 = arith.constant 0 : index
    %4 = vector.load %arg5[%c0_4, %c0_5] : memref<1x96xf32, #tpu.memory_space<vmem>>, vector<1x96xf32>
    %5 = vector.shape_cast %4 : vector<1x96xf32> to vector<96xf32>
    %6 = vector.shape_cast %5 : vector<96xf32> to vector<1x96xf32>
    %7 = vector.broadcast %6 : vector<1x96xf32> to vector<16x96xf32>
    %8 = arith.addf %3, %7 : vector<16x96xf32>
    %9 = vector.extract_strided_slice %8 {offsets = [0, 0], sizes = [16, 32], strides = [1, 1]} : vector<16x96xf32> to vector<16x32xf32>
    %10 = vector.shape_cast %9 : vector<16x32xf32> to vector<2x8x32xf32>
    %11 = vector.extract_strided_slice %8 {offsets = [0, 32], sizes = [16, 32], strides = [1, 1]} : vector<16x96xf32> to vector<16x32xf32>
    %12 = vector.shape_cast %11 : vector<16x32xf32> to vector<2x8x32xf32>
    %13 = vector.extract_strided_slice %8 {offsets = [0, 64], sizes = [16, 32], strides = [1, 1]} : vector<16x96xf32> to vector<16x32xf32>
    %14 = vector.shape_cast %13 : vector<16x32xf32> to vector<2x8x32xf32>
    %c0_6 = arith.constant 0 : index
    %c0_7 = arith.constant 0 : index
    %c0_8 = arith.constant 0 : index
    %15 = vector.load %arg2[%c0_6, %c0_7, %c0_8] : memref<4x1x32xf32, #tpu.memory_space<vmem>>, vector<4x1x32xf32>
    %16 = vector.shape_cast %10 : vector<2x8x32xf32> to vector<2x1x8x32xf32>
    %17 = vector.shape_cast %15 : vector<4x1x32xf32> to vector<1x4x1x32xf32>
    %18 = vector.broadcast %16 : vector<2x1x8x32xf32> to vector<2x4x8x32xf32>
    %19 = vector.broadcast %17 : vector<1x4x1x32xf32> to vector<2x4x8x32xf32>
    %20 = arith.mulf %18, %19 : vector<2x4x8x32xf32>
    %21 = vector.shape_cast %20 : vector<2x4x8x32xf32> to vector<2x32x32xf32>
    "tpu.trace_start"() <{level = 10 : i32, message = "bmc,bsc->bms"}> : () -> ()
    %cst_9 = arith.constant dense<0.000000e+00> : vector<2x32x8xf32>
    %22 = tpu.matmul %21, %12, %cst_9 {dimension_numbers = #tpu.dot_dimension_numbers<[2], [2], [1], [1], [0, 0, 0, 1, 1, 1], [0], [0]>} : vector<2x32x32xf32>, vector<2x8x32xf32>, vector<2x32x8xf32> -> vector<2x32x8xf32>
    "tpu.trace_stop"() : () -> ()
    %c0_10 = arith.constant 0 : index
    %c0_11 = arith.constant 0 : index
    %23 = vector.load %arg3[%c0_10, %c0_11] : memref<32x8xf32, #tpu.memory_space<vmem>>, vector<32x8xf32>
    %24 = vector.shape_cast %23 : vector<32x8xf32> to vector<1x32x8xf32>
    %25 = vector.broadcast %24 : vector<1x32x8xf32> to vector<2x32x8xf32>
    %26 = arith.addf %22, %25 : vector<2x32x8xf32>
    %cst_12 = arith.constant dense<0xFF800000> : vector<2x32xf32>
    %27 = vector.multi_reduction <maximumf>, %26, %cst_12 [2] : vector<2x32x8xf32> to vector<2x32xf32>
    %28 = vector.shape_cast %27 : vector<2x32xf32> to vector<2x32x1xf32>
    %29 = vector.broadcast %28 : vector<2x32x1xf32> to vector<2x32x8xf32>
    %30 = arith.subf %26, %29 : vector<2x32x8xf32>
    %31 = math.exp %30 : vector<2x32x8xf32>
    %cst_13 = arith.constant dense<0.000000e+00> : vector<2x32xf32>
    %32 = vector.multi_reduction <add>, %31, %cst_13 [2] : vector<2x32x8xf32> to vector<2x32xf32>
    %33 = vector.shape_cast %32 : vector<2x32xf32> to vector<2x32x1xf32>
    %34 = tpu.reciprocal %33 : vector<2x32x1xf32> -> vector<2x32x1xf32>
    %35 = vector.broadcast %34 : vector<2x32x1xf32> to vector<2x32x8xf32>
    %36 = arith.mulf %31, %35 : vector<2x32x8xf32>
    "tpu.trace_start"() <{level = 10 : i32, message = "bms,bsc->bmc"}> : () -> ()
    %cst_14 = arith.constant dense<0.000000e+00> : vector<2x32x32xf32>
    %37 = tpu.matmul %36, %14, %cst_14 {dimension_numbers = #tpu.dot_dimension_numbers<[2], [1], [1], [2], [0, 0, 0, 1, 1, 2], [0], [0]>} : vector<2x32x8xf32>, vector<2x8x32xf32>, vector<2x32x32xf32> -> vector<2x32x32xf32>
    "tpu.trace_stop"() : () -> ()
    %38 = vector.shape_cast %37 : vector<2x32x32xf32> to vector<2x4x8x32xf32>
    %39 = vector.shape_cast %15 : vector<4x1x32xf32> to vector<1x4x1x32xf32>
    %40 = vector.broadcast %39 : vector<1x4x1x32xf32> to vector<2x4x8x32xf32>
    %41 = arith.mulf %38, %40 : vector<2x4x8x32xf32>
    %42 = vector.extract_strided_slice %41 {offsets = [0, 0, 0, 0], sizes = [2, 1, 8, 32], strides = [1, 1, 1, 1]} : vector<2x4x8x32xf32> to vector<2x1x8x32xf32>
    %43 = vector.shape_cast %42 : vector<2x1x8x32xf32> to vector<2x8x32xf32>
    %44 = vector.extract_strided_slice %41 {offsets = [0, 1, 0, 0], sizes = [2, 1, 8, 32], strides = [1, 1, 1, 1]} : vector<2x4x8x32xf32> to vector<2x1x8x32xf32>
    %45 = vector.shape_cast %44 : vector<2x1x8x32xf32> to vector<2x8x32xf32>
    %46 = arith.addf %43, %45 : vector<2x8x32xf32>
    %47 = vector.extract_strided_slice %41 {offsets = [0, 2, 0, 0], sizes = [2, 1, 8, 32], strides = [1, 1, 1, 1]} : vector<2x4x8x32xf32> to vector<2x1x8x32xf32>
    %48 = vector.shape_cast %47 : vector<2x1x8x32xf32> to vector<2x8x32xf32>
    %49 = arith.addf %46, %48 : vector<2x8x32xf32>
    %50 = vector.extract_strided_slice %41 {offsets = [0, 3, 0, 0], sizes = [2, 1, 8, 32], strides = [1, 1, 1, 1]} : vector<2x4x8x32xf32> to vector<2x1x8x32xf32>
    %51 = vector.shape_cast %50 : vector<2x1x8x32xf32> to vector<2x8x32xf32>
    %52 = arith.addf %49, %51 : vector<2x8x32xf32>
    %53 = vector.shape_cast %52 : vector<2x8x32xf32> to vector<16x32xf32>
    %c0_15 = arith.constant 0 : index
    %c0_16 = arith.constant 0 : index
    %54 = vector.load %arg6[%c0_15, %c0_16] : memref<32x32xf32, #tpu.memory_space<vmem>>, vector<32x32xf32>
    %cst_17 = arith.constant dense<0.000000e+00> : vector<16x32xf32>
    %55 = tpu.matmul %53, %54, %cst_17 {dimension_numbers = #tpu.dot_dimension_numbers<[1], [0], [0], [1], [0, 0, 1, 1], [], []>} : vector<16x32xf32>, vector<32x32xf32>, vector<16x32xf32> -> vector<16x32xf32>
    %c0_18 = arith.constant 0 : index
    %c0_19 = arith.constant 0 : index
    %56 = vector.load %arg7[%c0_18, %c0_19] : memref<1x32xf32, #tpu.memory_space<vmem>>, vector<1x32xf32>
    %57 = vector.shape_cast %56 : vector<1x32xf32> to vector<32xf32>
    %58 = vector.shape_cast %57 : vector<32xf32> to vector<1x32xf32>
    %59 = vector.broadcast %58 : vector<1x32xf32> to vector<16x32xf32>
    %60 = arith.addf %55, %59 : vector<16x32xf32>
    %61 = vector.shape_cast %60 : vector<16x32xf32> to vector<2x8x32xf32>
    %c0_20 = arith.constant 0 : index
    %c0_21 = arith.constant 0 : index
    %c0_22 = arith.constant 0 : index
    %62 = vector.load %arg8[%c0_20, %c0_21, %c0_22] : memref<2x8x32xf32, #tpu.memory_space<vmem>>, vector<2x8x32xf32>
    tpu.vector_store %arg8[%c0_20, %c0_21, %c0_22], %61 {strides = array<i32>} : memref<2x8x32xf32, #tpu.memory_space<vmem>>, vector<2x8x32xf32>,
    return
  }
  func.func @transform_0(%arg0: i32) -> (i32, i32, i32) {
    %c0_i32 = arith.constant 0 : i32
    %c0_i32_0 = arith.constant 0 : i32
    %c0_i32_1 = arith.constant 0 : i32
    return %arg0, %c0_i32, %c0_i32_0 : i32, i32, i32
  }
  func.func @transform_1(%arg0: i32) -> (i32, i32, i32) {
    %c0_i32 = arith.constant 0 : i32
    %c0_i32_0 = arith.constant 0 : i32
    %c0_i32_1 = arith.constant 0 : i32
    %c0_i32_2 = arith.constant 0 : i32
    return %c0_i32, %c0_i32_0, %c0_i32_1 : i32, i32, i32
  }
  func.func @transform_2(%arg0: i32) -> (i32, i32) {
    %c0_i32 = arith.constant 0 : i32
    %c0_i32_0 = arith.constant 0 : i32
    %c0_i32_1 = arith.constant 0 : i32
    return %c0_i32, %c0_i32_0 : i32, i32
  }
  func.func @transform_3(%arg0: i32) -> (i32, i32) {
    %c0_i32 = arith.constant 0 : i32
    %c0_i32_0 = arith.constant 0 : i32
    %c0_i32_1 = arith.constant 0 : i32
    return %c0_i32, %c0_i32_0 : i32, i32
  }
  func.func @transform_4(%arg0: i32) -> (i32, i32) {
    %c0_i32 = arith.constant 0 : i32
    %c0_i32_0 = arith.constant 0 : i32
    %c0_i32_1 = arith.constant 0 : i32
    return %c0_i32, %c0_i32_0 : i32, i32
  }
  func.func @transform_5(%arg0: i32) -> (i32, i32) {
    %c0_i32 = arith.constant 0 : i32
    %c0_i32_0 = arith.constant 0 : i32
    %c0_i32_1 = arith.constant 0 : i32
    return %c0_i32, %c0_i32_0 : i32, i32
  }
  func.func @transform_6(%arg0: i32) -> (i32, i32) {
    %c0_i32 = arith.constant 0 : i32
    %c0_i32_0 = arith.constant 0 : i32
    %c0_i32_1 = arith.constant 0 : i32
    return %c0_i32, %c0_i32_0 : i32, i32
  }
  func.func @transform_7(%arg0: i32) -> (i32, i32, i32) {
    %c0_i32 = arith.constant 0 : i32
    %c0_i32_0 = arith.constant 0 : i32
    %c0_i32_1 = arith.constant 0 : i32
    return %arg0, %c0_i32, %c0_i32_0 : i32, i32, i32
  }
}

</mosaic_0001>

<bundles_post_ra>
// kernel: tpu_custom_call.1
= control target key start
LH: loop header
LB: loop body
LE: loop exit
PB: predicated region body
PF: predicated region fallthrough
CT: control target
= control target key end

     0   :  { %12 = vsyncpa [#allocation3], 0  ;;  %s1060_s0 = inlined_call_operand.hbm [shape: f32[2,8,32], index: 0, kind: input, shape index: {}]   ;;  %s1061_s1 = inlined_call_operand.vmem [shape: f32[4,1,32], index: 1, kind: input, shape index: {}]   ;;  %s1062_s2 = inlined_call_operand.vmem [shape: f32[32,8], index: 2, kind: input, shape index: {}]   ;;  %s1063_s3 = inlined_call_operand.vmem [shape: f32[32,96], index: 3, kind: input, shape index: {}]   ;;  %s1064_s4 = inlined_call_operand.vmem [shape: f32[1,96], index: 4, kind: input, shape index: {}]   ;;  %s1065_s5 = inlined_call_operand.hbm [shape: f32[32,32], index: 5, kind: input, shape index: {}]   ;;  %s1066_s6 = inlined_call_operand.vmem [shape: f32[1,32], index: 6, kind: input, shape index: {}]   ;;  %s1067_s7 = inlined_call_operand.hbm [shape: f32[2,8,32], index: 7, kind: output, shape index: {}]  }
   0x1   :  { %13 = vsyncpa [#allocation6], 0 }
   0x2   :  { %14 = vsyncpa [#allocation4], 0  ;;  %s19_s26 = sshll.u32 %s1060_s0, 4  ;;  %s731_s27 = smov [#allocation2]   ;;  %s20_s26 = int_to_ptr.hbm [resolvable:$true] %s19_s26 }
   0x3   :  { %s21_s28 = sshll.u32 %s731_s27, 4  ;;  %s40_s8 = sshll.u32 %s1065_s5, 4  ;;  %s22_s28 = int_to_ptr.vmem [resolvable:$true] %s21_s28  ;;  %s41_s8 = int_to_ptr.hbm [resolvable:$true] %s40_s8 }
   0x4   :  { %s732_s9 = smov 128   ;;  %s733_s10 = smov 8  }
   0x5   :  { %27 = dma.hbm_to_vmem [thread:$0]  %s20_s26, 256, %s22_s28, [#allocation3], %s732_s9, %s732_s9, %s733_s10  }
   0x6   :  { %s734_s11 = smov [#allocation5]  }
   0x7   :  { %s42_s12 = sshll.u32 %s734_s11, 4  ;;  %s43_s12 = int_to_ptr.vmem [resolvable:$true] %s42_s12 }
   0x8   :  { %48 = dma.hbm_to_vmem [thread:$0]  %s41_s8, 512, %s43_s12, [#allocation6], %s732_s9, %s732_s9, %s733_s10  }
   0x9   :  { %725 = dma.done.wait [#allocation3], 256  }
   0xa   :  { %726 = vsyncadd [#allocation3], 4294967040 }
   0xb   :  { %727 = dma.done.wait [#allocation6], 512  }
   0xc   :  { %728 = vsyncadd [#allocation6], 4294966784  ;;  %v64_v0 = vld [vmem:[%s1063_s3 + $0x18] sm:$0xff]  ;;  %v63_v1 = vld [vmem:[%s1063_s3 + $0x10] sm:$0xff]  ;;  %vm69_vm0 = vcmask 261120   ;;  %vm219_vm1 = vcmask 64512  }
   0xd   :  { %88 = vmatpush.msra.mxu0 %v64_v0  ;;  %595 = vmatpush.msra.mxu1 %v64_v0  ;;  %v62_v2 = vld [vmem:[%s1063_s3 + $0x8] sm:$0xff]  ;;  %v61_v3 = vld [vmem:[%s1063_s3] sm:$0xff]  ;;  %s735_s3 = smov 96   ;;  %v125_v35 = vld [vmem:[%s1062_s2 + $0x10] sm:$0xff]  ;;  %s737_s14 = smov [#allocation7]  }
   0xe   :  { %v59_v4 = vld [vmem:[#allocation2] sm:$0xff]  ;;  %v60_v5 = vld [vmem:[#allocation2 + $0x8] sm:$0xff]  ;;  %v126_v44 = vld [vmem:[%s1062_s2 + $0x18] sm:$0xff]  ;;  %s557_s15 = sshll.u32 %s737_s14, 4  ;;  %s559_s18 = sshll.u32 %s1067_s7, 4  ;;  %s558_s15 = int_to_ptr.vmem [resolvable:$true] %s557_s15  ;;  %s560_s18 = int_to_ptr.hbm [resolvable:$true] %s559_s18 }
   0xf   :  { %89 = vmatpush.msra.mxu0 %v63_v1  ;;  %596 = vmatpush.msra.mxu1 %v63_v1  ;;  %v615_v6 = vld [vmem:[%s1064_s4] ss:$0 sm:$0xff]  ;;  %v827_v15 = vld [vmem:[%s1061_s1 + $0x1] ss:$0 sm:$0xff]  ;;  %v839_v19 = vld [vmem:[%s1061_s1 + $0x2] ss:$0 sm:$0xff] }
  0x10   :  { %v818_v12 = vld [vmem:[%s1061_s1] ss:$0 sm:$0xff]  ;;  %v850_v22 = vld [vmem:[%s1061_s1 + $0x3] ss:$0 sm:$0xff]  ;;  %v124_v30 = vld [vmem:[%s1062_s2 + $0x8] sm:$0xff] }
  0x11   :  { %90 = vmatpush.msra.mxu0 %v62_v2  ;;  %597 = vmatpush.msra.mxu1 %v62_v2  ;;  %v123_v26 = vld [vmem:[%s1062_s2] sm:$0xff]  ;;  %s736_s2 = smov 64  }
  0x13   :  { %91 = vmatpush.msra.mxu0 %v61_v3  ;;  %598 = vmatpush.msra.mxu1 %v61_v3 }
  0x14   :  { %573 = vmatmul.msk.f32.vlgmr.msra.gmra.mxu0 %vm69_vm0, %v59_v4  ;;  %574 = vmatmul.msk.f32.vlgmr.msra.gmra.mxu1 %vm69_vm0, %v60_v5 }
  0x91   :  { %v93_v7 = vpop.f32.mrf.mxu0  ;;  %v96_v8 = vpop.f32.mrf.mxu1 }
  0x92   :  { %v807_v9 = vadd.f32 %v615_v6, %v93_v7  ;;  %v809_v10 = vadd.f32 %v615_v6, %v96_v8 }
  0x94   :  { %128 = vrot.lane.b32.xlu0 %v807_v9, %s735_s3  ;;  %v610_v11 = vpack.i.bf16 %v809_v10, %v807_v9  ;;  %v115_v14 = vmul.f32 %v818_v12, %v807_v9  ;;  %v116_v17 = vmul.f32 %v827_v15, %v807_v9  ;;  %v119_v18 = vmul.f32 %v818_v12, %v809_v10 }
  0x95   :  { %v117_v20 = vmul.f32 %v839_v19, %v807_v9  ;;  %v120_v21 = vmul.f32 %v827_v15, %v809_v10  ;;  %v118_v23 = vmul.f32 %v850_v22, %v807_v9  ;;  %v121_v24 = vmul.f32 %v839_v19, %v809_v10 }
  0x96   :  { %v122_v25 = vmul.f32 %v850_v22, %v809_v10 }
  0x9c   :  { %174 = vrot.lane.b32.xlu0 %v809_v10, %s735_s3 }
 0x106   :  { %v129_v13 = vpop.permute.xlu0 %128 }
 0x107   :  { %575 = vmatpush.xpose.msk.msrb.mxu1 %vm69_vm0, %v129_v13 }
 0x10a   :  { %576 = vmatmul.msk.f32.vlgmr.msrb.gmra.mxu1 %vm69_vm0, %v115_v14 }
 0x10e   :  { %v175_v16 = vpop.permute.xlu0 %174 }
 0x10f   :  { %580 = vmatpush.xpose.msk.msra.mxu2 %vm69_vm0, %v175_v16 }
 0x112   :  { %577 = vmatmul.msk.f32.gmra.mxu1 %vm69_vm0, %v116_v17  ;;  %581 = vmatmul.msk.f32.vlgmr.msra.gmra.mxu2 %vm69_vm0, %v119_v18 }
 0x11a   :  { %578 = vmatmul.msk.f32.gmra.mxu1 %vm69_vm0, %v117_v20  ;;  %582 = vmatmul.msk.f32.gmra.mxu2 %vm69_vm0, %v120_v21 }
 0x122   :  { %579 = vmatmul.msk.f32.gmra.mxu1 %vm69_vm0, %v118_v23  ;;  %583 = vmatmul.msk.f32.gmra.mxu2 %vm69_vm0, %v121_v24 }
 0x12a   :  { %584 = vmatmul.msk.f32.gmra.mxu2 %vm69_vm0, %v122_v25 }
 0x187   :  { %v161_v27 = vpop.f32.mrf.mxu1 }
 0x188   :  { %v162_v28 = vadd.f32 %v161_v27, %v123_v26 }
 0x18a   :  { %v220_v29 = vsel %vm219_vm1, %v162_v28, -inf }
 0x18b   :  { %221 = vmax.xlane.f32.xlu1 %v220_v29 }
 0x18f   :  { %v164_v31 = vpop.f32.mrf.mxu1 }
 0x190   :  { %v165_v32 = vadd.f32 %v164_v31, %v124_v30 }
 0x192   :  { %v223_v33 = vsel %vm219_vm1, %v165_v32, -inf }
 0x193   :  { %224 = vmax.xlane.f32.xlu2 %v223_v33 }
 0x195   :  { %v207_v34 = vpop.f32.mrf.mxu2 }
 0x196   :  { %v208_v36 = vadd.f32 %v207_v34, %v123_v26 }
 0x197   :  { %v167_v37 = vpop.f32.mrf.mxu1 }
 0x198   :  { %v168_v38 = vadd.f32 %v167_v37, %v125_v35  ;;  %v232_v39 = vsel %vm219_vm1, %v208_v36, -inf }
 0x199   :  { %233 = vmax.xlane.f32.xlu1 %v232_v39 }
 0x19a   :  { %v226_v40 = vsel %vm219_vm1, %v168_v38, -inf }
 0x19b   :  { %227 = vmax.xlane.f32.xlu0 %v226_v40 }
 0x19d   :  { %v210_v41 = vpop.f32.mrf.mxu2 }
 0x19e   :  { %v211_v42 = vadd.f32 %v210_v41, %v124_v30 }
 0x19f   :  { %v170_v45 = vpop.f32.mrf.mxu1 }
 0x1a0   :  { %v235_v43 = vsel %vm219_vm1, %v211_v42, -inf  ;;  %v171_v46 = vadd.f32 %v170_v45, %v126_v44 }
 0x1a1   :  { %236 = vmax.xlane.f32.xlu2 %v235_v43 }
 0x1a2   :  { %v229_v49 = vsel %vm219_vm1, %v171_v46, -inf }
 0x1a5   :  { %v213_v47 = vpop.f32.mrf.mxu2 }
 0x1a6   :  { %v214_v48 = vadd.f32 %v213_v47, %v125_v35 }
 0x1a8   :  { %v238_v50 = vsel %vm219_vm1, %v214_v48, -inf }
 0x1a9   :  { %230 = vmax.xlane.f32.xlu2 %v229_v49  ;;  %239 = vmax.xlane.f32.xlu1 %v238_v50 }
 0x1ad   :  { %v216_v51 = vpop.f32.mrf.mxu2 }
 0x1ae   :  { %v217_v52 = vadd.f32 %v216_v51, %v126_v44 }
 0x1b0   :  { %v241_v53 = vsel %vm219_vm1, %v217_v52, -inf }
 0x1b1   :  { %242 = vmax.xlane.f32.xlu1 %v241_v53 }
 0x1fe   :  { %v222_v54 = vpop.xlane.xlu1 %221 }
 0x1ff   :  { %v244_v55 = vsub.f32 %v162_v28, %v222_v54 }
 0x201   :  { %v252_v56 = vmul.f32 1.442695, %v244_v55 }
 0x203   :  { %621 = vpow2.f32 %v252_v56 }
 0x206   :  { %v225_v57 = vpop.xlane.xlu2 %224 }
 0x207   :  { %v245_v58 = vsub.f32 %v165_v32, %v225_v57 }
 0x209   :  { %v881_v59 = vpop.eup %621  ;;  %v254_v60 = vmul.f32 1.442695, %v245_v58 }
 0x20a   :  { %v268_v61 = vsel %vm219_vm1, %v881_v59, 0.0 }
 0x20b   :  { %623 = vpow2.f32 %v254_v60  ;;  %269 = vadd.xlane.f32.xlu2 %v268_v61 }
 0x20c   :  { %v234_v62 = vpop.xlane.xlu1 %233 }
 0x20d   :  { %v248_v63 = vsub.f32 %v208_v36, %v234_v62 }
 0x20e   :  { %v228_v0 = vpop.xlane.xlu0 %227 }
 0x20f   :  { %v260_v1 = vmul.f32 1.442695, %v248_v63  ;;  %v246_v2 = vsub.f32 %v168_v38, %v228_v0 }
 0x211   :  { %v885_v3 = vpop.eup %623  ;;  %625 = vpow2.f32 %v260_v1  ;;  %v256_v4 = vmul.f32 1.442695, %v246_v2 }
 0x212   :  { %v271_v5 = vsel %vm219_vm1, %v885_v3, 0.0 }
 0x213   :  { %627 = vpow2.f32 %v256_v4  ;;  %272 = vadd.xlane.f32.xlu2 %v271_v5 }
 0x214   :  { %v237_v6 = vpop.xlane.xlu2 %236 }
 0x215   :  { %v249_v7 = vsub.f32 %v211_v42, %v237_v6 }
 0x217   :  { %v889_v8 = vpop.eup %625  ;;  %v262_v13 = vmul.f32 1.442695, %v249_v7 }
 0x218   :  { %v280_v14 = vsel %vm219_vm1, %v889_v8, 0.0 }
 0x219   :  { %v893_v16 = vpop.eup %627  ;;  %629 = vpow2.f32 %v262_v13  ;;  %281 = vadd.xlane.f32.xlu1 %v280_v14 }
 0x21a   :  { %v274_v17 = vsel %vm219_vm1, %v893_v16, 0.0 }
 0x21b   :  { %275 = vadd.xlane.f32.xlu2 %v274_v17 }
 0x21c   :  { %v240_v18 = vpop.xlane.xlu1 %239  ;;  %v231_v20 = vpop.xlane.xlu2 %230 }
 0x21d   :  { %v250_v21 = vsub.f32 %v214_v48, %v240_v18  ;;  %v247_v25 = vsub.f32 %v171_v46, %v231_v20 }
 0x21f   :  { %v897_v23 = vpop.eup %629  ;;  %v264_v24 = vmul.f32 1.442695, %v250_v21  ;;  %v258_v27 = vmul.f32 1.442695, %v247_v25 }
 0x220   :  { %v283_v26 = vsel %vm219_vm1, %v897_v23, 0.0 }
 0x221   :  { %284 = vadd.xlane.f32.xlu1 %v283_v26  ;;  %631 = vpow2.f32 %v264_v24 }
 0x222   :  { %633 = vpow2.f32 %v258_v27 }
 0x224   :  { %v243_v28 = vpop.xlane.xlu1 %242 }
 0x225   :  { %v251_v29 = vsub.f32 %v217_v52, %v243_v28 }
 0x227   :  { %v266_v30 = vmul.f32 1.442695, %v251_v29  ;;  %v901_v31 = vpop.eup %631 }
 0x228   :  { %v286_v32 = vsel %vm219_vm1, %v901_v31, 0.0  ;;  %v905_v33 = vpop.eup %633 }
 0x229   :  { %635 = vpow2.f32 %v266_v30  ;;  %287 = vadd.xlane.f32.xlu2 %v286_v32  ;;  %v277_v36 = vsel %vm219_vm1, %v905_v33, 0.0 }
 0x22f   :  { %v907_v34 = vpop.eup %635 }
 0x230   :  { %v289_v35 = vsel %vm219_vm1, %v907_v34, 0.0 }
 0x231   :  { %290 = vadd.xlane.f32.xlu0 %v289_v35  ;;  %278 = vadd.xlane.f32.xlu2 %v277_v36 }
 0x23a   :  { %611 = vrot.lane.b32.xlu1 %v610_v11, %s736_s2 }
 0x27e   :  { %v270_v37 = vpop.xlane.xlu2 %269 }
 0x27f   :  { %637 = vrcp.f32 %v270_v37  ;;  %v303_v56 = vand.u32 2147483648, %v270_v37  ;;  %vm297_vm4 = vweird.f32 %v270_v37  ;;  %v301_v63 = vand.u32 2147483647, %v270_v37 }
 0x281   :  { %v304_v7 = vor.u32 1.1754944e-38, %v303_v56  ;;  %vm302_vm8 = vcmp.eq.f32.partialorder %v301_v63, 8.507059e+37 }
 0x285   :  { %v638_v40 = vpop.eup %637 }
 0x286   :  { %v916_v38 = vpop.xlane.xlu2 %272  ;;  %v293_v44 = vmul.f32 %v638_v40, %v270_v37  ;;  %vm298_vm2 = vweird.f32 %v638_v40 }
 0x287   :  { %vm299_vm6 = vmor %vm297_vm4, %vm298_vm2  ;;  %vm311_vm12 = vweird.f32 %v916_v38  ;;  %v317_v27 = vand.u32 2147483648, %v916_v38 }
 0x288   :  { %v294_v10 = vsub.f32 1.0, %v293_v44 }
 0x28a   :  { %v295_v49 = vmul.f32 %v638_v40, %v294_v10 }
 0x28c   :  { %v282_v39 = vpop.xlane.xlu1 %281  ;;  %v296_v54 = vadd.f32 %v638_v40, %v295_v49 }
 0x28d   :  { %639 = vrcp.f32 %v282_v39  ;;  %v359_v61 = vand.u32 2147483648, %v282_v39  ;;  %vm353_vm5 = vweird.f32 %v282_v39  ;;  %v357_v1 = vand.u32 2147483647, %v282_v39 }
 0x28e   :  { %641 = vrcp.f32 %v916_v38  ;;  %v921_v43 = vpop.xlane.xlu2 %275  ;;  %v300_v6 = vsel %vm299_vm6, %v638_v40, %v296_v54 }
 0x28f   :  { %v360_v17 = vor.u32 1.1754944e-38, %v359_v61  ;;  %vm358_vm9 = vcmp.eq.f32.partialorder %v357_v1, 8.507059e+37  ;;  %v305_v18 = vsel %vm302_vm8, %v304_v7, %v300_v6  ;;  %vm325_vm6 = vweird.f32 %v921_v43 }
 0x293   :  { %v640_v42 = vpop.eup %639 }
 0x294   :  { %v918_v41 = vpop.xlane.xlu1 %284  ;;  %v349_v45 = vmul.f32 %v640_v42, %v282_v39  ;;  %v924_v9 = vpop.eup %641  ;;  %vm354_vm3 = vweird.f32 %v640_v42  ;;  %v404_v39 = vmul.f32 %v881_v59, %v305_v18 }
 0x295   :  { %643 = vrcp.f32 %v918_v41  ;;  %v307_v48 = vmul.f32 %v924_v9, %v916_v38  ;;  %vm947_vm7 = vmor %vm353_vm5, %vm354_vm3  ;;  %vm312_vm10 = vweird.f32 %v924_v9  ;;  %vm367_vm13 = vweird.f32 %v918_v41 }
 0x296   :  { %v350_v46 = vsub.f32 1.0, %v349_v45  ;;  %645 = vrcp.f32 %v921_v43  ;;  %v373_v32 = vand.u32 2147483648, %v918_v41  ;;  %vm973_vm14 = vmor %vm311_vm12, %vm312_vm10  ;;  %v371_v45 = vand.u32 2147483647, %v918_v41 }
 0x297   :  { %v308_v52 = vsub.f32 1.0, %v307_v48  ;;  %v318_v48 = vor.u32 1.1754944e-38, %v317_v27 }
 0x298   :  { %v351_v51 = vmul.f32 %v640_v42, %v350_v46  ;;  %v374_v49 = vor.u32 1.1754944e-38, %v373_v32  ;;  %vm372_vm3 = vcmp.eq.f32.partialorder %v371_v45, 8.507059e+37 }
 0x299   :  { %v309_v0 = vmul.f32 %v924_v9, %v308_v52 }
 0x29a   :  { %v352_v57 = vadd.f32 %v640_v42, %v351_v51 }
 0x29b   :  { %v926_v11 = vpop.eup %643  ;;  %v310_v20 = vadd.f32 %v924_v9, %v309_v0 }
 0x29c   :  { %v928_v47 = vpop.xlane.xlu2 %287  ;;  %v363_v50 = vmul.f32 %v926_v11, %v918_v41  ;;  %v936_v55 = vpop.eup %645  ;;  %v356_v14 = vsel %vm947_vm7, %v640_v42, %v352_v57  ;;  %vm368_vm11 = vweird.f32 %v926_v11  ;;  %v315_v42 = vand.u32 2147483647, %v916_v38 }
 0x29d   :  { %647 = vrcp.f32 %v928_v47  ;;  %v321_v4 = vmul.f32 %v936_v55, %v921_v43  ;;  %v361_v24 = vsel %vm358_vm9, %v360_v17, %v356_v14  ;;  %vm982_vm15 = vmor %vm367_vm13, %vm368_vm11  ;;  %v314_v59 = vsel %vm973_vm14, %v924_v9, %v310_v20 }
 0x29e   :  { %v364_v53 = vsub.f32 1.0, %v363_v50  ;;  %v408_v40 = vmul.f32 %v889_v8, %v361_v24  ;;  %v331_v9 = vand.u32 2147483648, %v921_v43  ;;  %vm316_vm2 = vcmp.eq.f32.partialorder %v315_v42, 8.507059e+37 }
 0x29f   :  { %v322_v21 = vsub.f32 1.0, %v321_v4  ;;  %v319_v50 = vsel %vm316_vm2, %v318_v48, %v314_v59  ;;  %vm326_vm4 = vweird.f32 %v936_v55  ;;  %v387_v56 = vand.u32 2147483648, %v928_v47 }
 0x2a0   :  { %v365_v5 = vmul.f32 %v926_v11, %v364_v53  ;;  %v329_v57 = vand.u32 2147483647, %v921_v43  ;;  %vm381_vm7 = vweird.f32 %v928_v47  ;;  %v405_v61 = vmul.f32 %v885_v3, %v319_v50  ;;  %vm327_vm8 = vmor %vm325_vm6, %vm326_vm4 }
 0x2a1   :  { %v323_v10 = vmul.f32 %v936_v55, %v322_v21  ;;  %v385_v0 = vand.u32 2147483647, %v928_v47  ;;  %v332_v2 = vor.u32 1.1754944e-38, %v331_v9  ;;  %v388_v3 = vor.u32 1.1754944e-38, %v387_v56 }
 0x2a2   :  { %v366_v25 = vadd.f32 %v926_v11, %v365_v5  ;;  %vm330_vm10 = vcmp.eq.f32.partialorder %v329_v57, 8.507059e+37 }
 0x2a3   :  { %v940_v60 = vpop.eup %647  ;;  %v324_v51 = vadd.f32 %v936_v55, %v323_v10  ;;  %vm386_vm11 = vcmp.eq.f32.partialorder %v385_v0, 8.507059e+37 }
 0x2a4   :  { %v938_v58 = vpop.xlane.xlu0 %290  ;;  %v942_v62 = vpop.xlane.xlu2 %278  ;;  %v377_v13 = vmul.f32 %v940_v60, %v928_v47  ;;  %v370_v8 = vsel %vm982_vm15, %v926_v11, %v366_v25  ;;  %vm382_vm5 = vweird.f32 %v940_v60 }
 0x2a5   :  { %649 = vrcp.f32 %v938_v58  ;;  %v375_v11 = vsel %vm372_vm3, %v374_v49, %v370_v8  ;;  %v328_v1 = vsel %vm327_vm8, %v936_v55, %v324_v51  ;;  %vm383_vm9 = vmor %vm381_vm7, %vm382_vm5  ;;  %v345_v7 = vand.u32 2147483648, %v942_v62 }
 0x2a6   :  { %651 = vrcp.f32 %v942_v62  ;;  %v378_v28 = vsub.f32 1.0, %v377_v13  ;;  %v409_v63 = vmul.f32 %v897_v23, %v375_v11  ;;  %v333_v23 = vsel %vm330_vm10, %v332_v2, %v328_v1 }
 0x2a7   :  { %vm395_vm14 = vweird.f32 %v938_v58  ;;  %v401_v13 = vand.u32 2147483648, %v938_v58  ;;  %vm339_vm15 = vweird.f32 %v942_v62  ;;  %v343_v14 = vand.u32 2147483647, %v942_v62 }
 0x2a8   :  { %v379_v38 = vmul.f32 %v940_v60, %v378_v28  ;;  %v399_v17 = vand.u32 2147483647, %v938_v58  ;;  %v346_v24 = vor.u32 1.1754944e-38, %v345_v7  ;;  %v516_v28 = vld [vmem:[#allocation5 + $0x10] sm:$0xff] }
 0x2a9   :  { %vm344_vm4 = vcmp.eq.f32.partialorder %v343_v14, 8.507059e+37 }
 0x2aa   :  { %v380_v54 = vadd.f32 %v940_v60, %v379_v38  ;;  %vm400_vm5 = vcmp.eq.f32.partialorder %v399_v17, 8.507059e+37 }
 0x2ab   :  { %v963_v26 = vpop.eup %649 }
 0x2ac   :  { %v612_v29 = vpop.permute.xlu1 %611  ;;  %v967_v30 = vpop.eup %651  ;;  %v391_v41 = vmul.f32 %v963_v26, %v938_v58  ;;  %v384_v43 = vsel %vm383_vm9, %v940_v60, %v380_v54  ;;  %vm396_vm12 = vweird.f32 %v963_v26  ;;  %v406_v60 = vmul.f32 %v893_v16, %v333_v23 }
 0x2ad   :  { %v614_v35 = vunpack.i.h.bf16 %v612_v29  ;;  %v613_v36 = vunpack.i.l.bf16 %v612_v29  ;;  %v335_v46 = vmul.f32 %v967_v30, %v942_v62  ;;  %v389_v47 = vsel %vm386_vm11, %v388_v3, %v384_v43  ;;  %vm397_vm2 = vmor %vm395_vm14, %vm396_vm12  ;;  %v514_v29 = vld [vmem:[#allocation5] sm:$0xff] }
 0x2ae   :  { %v392_v53 = vsub.f32 1.0, %v391_v41  ;;  %vm340_vm13 = vweird.f32 %v967_v30  ;;  %v410_v18 = vmul.f32 %v901_v31, %v389_v47  ;;  %v402_v16 = vor.u32 1.1754944e-38, %v401_v13  ;;  %v517_v31 = vld [vmem:[#allocation5 + $0x18] sm:$0xff] }
 0x2af   :  { %442 = vmatpush.msra.mxu3 %v613_v36  ;;  %486 = vmatpush.msrb.mxu0 %v614_v35  ;;  %v336_v52 = vsub.f32 1.0, %v335_v46  ;;  %vm341_vm3 = vmor %vm339_vm15, %vm340_vm13 }
 0x2b0   :  { %585 = vmatmul.msk.f32.vlgmr.msra.gmra.mxu3 %vm219_vm1, %v404_v39  ;;  %589 = vmatmul.msk.f32.vlgmr.msrb.gmra.mxu0 %vm219_vm1, %v408_v40  ;;  %v393_v5 = vmul.f32 %v963_v26, %v392_v53 }
 0x2b1   :  { %v337_v4 = vmul.f32 %v967_v30, %v336_v52  ;;  %540 = vmatpush.msrb.mxu2 %v517_v31  ;;  %599 = vmatpush.msrb.mxu3 %v517_v31 }
 0x2b2   :  { %v394_v6 = vadd.f32 %v963_v26, %v393_v5 }
 0x2b3   :  { %v338_v55 = vadd.f32 %v967_v30, %v337_v4  ;;  %541 = vmatpush.msrb.mxu2 %v516_v28  ;;  %600 = vmatpush.msrb.mxu3 %v516_v28 }
 0x2b4   :  { %v398_v21 = vsel %vm397_vm2, %v963_v26, %v394_v6  ;;  %v515_v26 = vld [vmem:[#allocation5 + $0x8] sm:$0xff] }
 0x2b5   :  { %v342_v20 = vsel %vm341_vm3, %v967_v30, %v338_v55  ;;  %v403_v62 = vsel %vm400_vm5, %v402_v16, %v398_v21  ;;  %542 = vmatpush.msrb.mxu2 %v515_v26  ;;  %601 = vmatpush.msrb.mxu3 %v515_v26 }
 0x2b6   :  { %v347_v25 = vsel %vm344_vm4, %v346_v24, %v342_v20  ;;  %v411_v58 = vmul.f32 %v907_v34, %v403_v62 }
 0x2b7   :  { %v407_v27 = vmul.f32 %v905_v33, %v347_v25  ;;  %543 = vmatpush.msrb.mxu2 %v514_v29  ;;  %602 = vmatpush.msrb.mxu3 %v514_v29 }
 0x2b8   :  { %586 = vmatmul.msk.f32.gmra.mxu3 %vm219_vm1, %v405_v61  ;;  %590 = vmatmul.msk.f32.gmra.mxu0 %vm219_vm1, %v409_v63 }
 0x2c0   :  { %587 = vmatmul.msk.f32.gmra.mxu3 %vm219_vm1, %v406_v60  ;;  %591 = vmatmul.msk.f32.gmra.mxu0 %vm219_vm1, %v410_v18 }
 0x2c8   :  { %588 = vmatmul.msk.f32.gmra.mxu3 %vm219_vm1, %v407_v27  ;;  %592 = vmatmul.msk.f32.gmra.mxu0 %vm219_vm1, %v411_v58 }
 0x32d   :  { %v488_v30 = vpop.f32.mrf.mxu0 }
 0x32e   :  { %v504_v37 = vmul.f32 %v818_v12, %v488_v30 }
 0x333   :  { %v444_v33 = vpop.f32.mrf.mxu3 }
 0x334   :  { %v500_v8 = vmul.f32 %v818_v12, %v444_v33 }
 0x335   :  { %v491_v32 = vpop.f32.mrf.mxu0 }
 0x336   :  { %v505_v36 = vmul.f32 %v827_v15, %v491_v32 }
 0x338   :  { %v509_v42 = vadd.f32 %v505_v36, %v504_v37 }
 0x33b   :  { %v447_v34 = vpop.f32.mrf.mxu3 }
 0x33c   :  { %v501_v45 = vmul.f32 %v827_v15, %v447_v34  ;;  %v620_v15 = vld [vmem:[%s1066_s6] ss:$0 sm:$0xff] }
 0x33d   :  { %v494_v35 = vpop.f32.mrf.mxu0 }
 0x33e   :  { %v506_v39 = vmul.f32 %v839_v19, %v494_v35  ;;  %v508_v41 = vadd.f32 %v501_v45, %v500_v8 }
 0x340   :  { %v511_v10 = vadd.f32 %v509_v42, %v506_v39 }
 0x343   :  { %v450_v40 = vpop.f32.mrf.mxu3 }
 0x344   :  { %v502_v38 = vmul.f32 %v839_v19, %v450_v40 }
 0x345   :  { %v497_v44 = vpop.f32.mrf.mxu0 }
 0x346   :  { %v507_v59 = vmul.f32 %v850_v22, %v497_v44  ;;  %v510_v49 = vadd.f32 %v508_v41, %v502_v38 }
 0x348   :  { %v513_v46 = vadd.f32 %v511_v10, %v507_v59 }
 0x34a   :  { %594 = vmatmul.msk.f32.vlgmr.msrb.gmra.mxu3 %vm69_vm0, %v513_v46 }
 0x34b   :  { %v453_v48 = vpop.f32.mrf.mxu3 }
 0x34c   :  { %v503_v9 = vmul.f32 %v850_v22, %v453_v48 }
 0x34e   :  { %v512_v50 = vadd.f32 %v510_v49, %v503_v9 }
 0x350   :  { %593 = vmatmul.msk.f32.vlgmr.msrb.gmra.mxu2 %vm69_vm0, %v512_v50 }
 0x3cd   :  { %v548_v11 = vpop.f32.mrf.mxu3 }
 0x3ce   :  { %v549_v51 = vadd.f32 %v620_v15, %v548_v11 }
 0x3d0   :  { %552 = vst.msk [vmem:[#allocation7 + $0x8] sm:$0xff] %vm69_vm0, %v549_v51 }
 0x3d3   :  { %v545_v12 = vpop.f32.mrf.mxu2 }
 0x3d4   :  { %v546_v19 = vadd.f32 %v620_v15, %v545_v12 }
 0x3d6   :  { %551 = vst.msk [vmem:[#allocation7] sm:$0xff] %vm69_vm0, %v546_v19 }
 0x3d7   :  { %565 = dma.vmem_to_hbm [thread:$0]  %s558_s15, 256, %s560_s18, [#allocation4], %s732_s9, %s732_s9, %s733_s10  }
 0x3d8   :  { %729 = dma.done.wait [#allocation4], 256  }
 0x3d9   :  { %730 = vsyncadd [#allocation4], 4294967040 }
 0x3da   :  { %570 = vsyncpa [#allocation3], 1 }
 0x3db   :  { %571 = vsyncpa [#allocation6], 1 }
 0x3dc   :  { %572 = vsyncpa [#allocation4], 1 }

</bundles_post_ra>
